<compile_context>
chip_gen: v7x
topology: tpu7x:2x2x1
jax: 0.10.0
libtpu: 0.0.40
codegen_flags: <defaults>
</compile_context>

<pallas_src>
import jax
import jax.numpy as jnp
from jax.experimental import pallas as pl
from jax.experimental.pallas import tpu as pltpu


def _flatten_copy_kernel(x_ref, o_ref):
    # x_ref / o_ref: (TB, TD) tile of the row-major flattened input.
    # Flatten has no arithmetic — it is exactly a copy of the tile.
    o_ref[...] = x_ref[...]


def flatten(x, *, tb=8, td=2048):
    """PyTorch Flatten: x.view(x.size(0), -1).

    x: (B, ...) array with arbitrary trailing dims.
    Returns (B, prod(trailing dims)) in the same dtype.
    """
    B = x.shape[0]
    D = 1
    for d in x.shape[1:]:
        D *= d

    # Row-major collapse of the trailing dims: metadata-only in XLA, so the
    # only HBM traffic is the kernel's own read + write.
    x2 = x.reshape(B, D)

    # Tile sizes.  TPU rule: the last block dim must be a multiple of 128 (or
    # the full extent) and the second-to-last a multiple of 8 (or the full
    # extent).  Fall back to full extents for small / odd shapes.
    TB = tb if (B >= tb and B % tb == 0) else B
    TD = td if (D >= td and D % td == 0 and td % 128 == 0) else D

    grid = (pl.cdiv(B, TB), pl.cdiv(D, TD))

    tile_bytes = TB * TD * x2.dtype.itemsize
    # double-buffered input tile + double-buffered output tile, plus headroom;
    # stays well under v7x's 64 MiB for any sane tile choice.
    vmem_limit = min(max(4 * tile_bytes + (1 << 20), 4 << 20), 48 << 20)

    out = pl.pallas_call(
        _flatten_copy_kernel,
        out_shape=jax.ShapeDtypeStruct((B, D), x2.dtype),
        grid_spec=pltpu.PrefetchScalarGridSpec(
            num_scalar_prefetch=0,
            grid=grid,
            in_specs=[pl.BlockSpec((TB, TD), lambda i, j: (i, j))],
            out_specs=pl.BlockSpec((TB, TD), lambda i, j: (i, j)),
        ),
        compiler_params=pltpu.CompilerParams(
            dimension_semantics=("parallel", "parallel"),
            vmem_limit_bytes=vmem_limit,
        ),
    )(x2)
    return out


def _reference(x):
    return x.reshape(x.shape[0], -1)


if __name__ == "__main__":
    key = jax.random.PRNGKey(0)

    # Small shapes consistent with the module: batch=2, channels=4, 16x16 spatial.
    B, C, H, W = 2, 4, 16, 16
    x = jax.random.normal(key, (B, C, H, W), jnp.float32)

    y = flatten(x)
    jax.block_until_ready(y)

    y_ref = _reference(x)
    assert y.shape == (B, C * H * W)
    assert y.dtype == x.dtype
    assert jnp.array_equal(y, y_ref)

    print("KERNEL_OK")
</pallas_src>

<mosaic_0001>
module attributes {stable_mosaic.version = 11 : i64} {
  func.func @_flatten_copy_kernel(%arg0: i32, %arg1: i32, %arg2: memref<2x1024xf32, #tpu.memory_space<vmem>>, %arg3: memref<2x1024xf32, #tpu.memory_space<vmem>>) attributes {dimension_semantics = [#tpu.dimension_semantics<parallel>, #tpu.dimension_semantics<parallel>], iteration_bounds = array<i64: 1, 1>, scalar_prefetch = 0 : i64, scratch_operands = 0 : i64, tpu.core_type = #tpu.core_type<tc>, window_params = [{transform_indices = @transform_0, window_bounds = array<i64: 2, 1024>}, {transform_indices = @transform_1, window_bounds = array<i64: 2, 1024>}]} {
    %c0 = arith.constant 0 : index
    %c0_0 = arith.constant 0 : index
    %0 = vector.load %arg2[%c0, %c0_0] : memref<2x1024xf32, #tpu.memory_space<vmem>>, vector<2x1024xf32>
    %c0_1 = arith.constant 0 : index
    %c0_2 = arith.constant 0 : index
    %1 = vector.load %arg3[%c0_1, %c0_2] : memref<2x1024xf32, #tpu.memory_space<vmem>>, vector<2x1024xf32>
    tpu.vector_store %arg3[%c0_1, %c0_2], %0 {strides = array<i32>} : memref<2x1024xf32, #tpu.memory_space<vmem>>, vector<2x1024xf32>,
    return
  }
  func.func @transform_0(%arg0: i32, %arg1: i32) -> (i32, i32) {
    %c0_i32 = arith.constant 0 : i32
    return %arg0, %arg1 : i32, i32
  }
  func.func @transform_1(%arg0: i32, %arg1: i32) -> (i32, i32) {
    %c0_i32 = arith.constant 0 : i32
    return %arg0, %arg1 : i32, i32
  }
}

</mosaic_0001>

<bundles_post_ra>
// kernel: tpu_custom_call.1
= control target key start
LH: loop header
LB: loop body
LE: loop exit
PB: predicated region body
PF: predicated region fallthrough
CT: control target
= control target key end

     0   :  { %6 = vsyncpa [#allocation3], 0  ;;  %s126_s0 = inlined_call_operand.hbm [shape: f32[2,1024], index: 0, kind: input, shape index: {}]   ;;  %s127_s1 = inlined_call_operand.hbm [shape: f32[2,1024], index: 1, kind: output, shape index: {}]  }
   0x1   :  { %7 = vsyncpa [#allocation4], 0  ;;  %s90_s6 = smov [#allocation2]   ;;  %s42_s10 = scalar_lea.hbm %s126_s0, 256 }
   0x2   :  { %s14_s7 = sshll.u32 %s90_s6, 4  ;;  %p43_p0 = scmp.ne.s32.totalorder %s126_s0, %s42_s10  ;;  %s15_s7 = int_to_ptr.vmem [resolvable:$true] %s14_s7 }
   0x3   :  { %p46_p1 = scmp.lt.u32.totalorder %s42_s10, %s126_s0 }
   0x5   :  { %p48_p2 = pnand %p46_p1, %p43_p0 }
   0x7   :  { %51 = shalt.err (!%p48_p2)
}
   0x8   :  { %s52_s15 = scalar_lea.vmem %s15_s7, 256  ;;  %p57_p4 = scmp.lt.s32.totalorder %s15_s7, %s15_s7 }
   0x9   :  { %p53_p3 = scmp.ne.s32.totalorder %s15_s7, %s52_s15  ;;  %p58_p5 = scmp.lt.s32.totalorder %s52_s15, %s52_s15 }
   0xb   :  { %p59_p6 = por %p58_p5, %p57_p4 }
   0xd   :  { %p60_p7 = pnand %p59_p6, %p53_p3 }
   0xf   :  { %63 = shalt.err (!%p60_p7)
}
  0x10   :  { %17 = dma.hbm_to_vmem [thread:$0]  %s126_s0, 256, %s15_s7, [#allocation3]  }
  0x11   :  { %86 = dma.done.wait [#allocation3], 256  }
  0x12   :  { %87 = vsyncadd [#allocation3], 4294967040  ;;  %s91_s18 = smov [#allocation5]   ;;  %v21_v0 = vld [vmem:[#allocation2] sm:$0xff]  ;;  %v22_v1 = vld [vmem:[#allocation2 + $0x8] sm:$0xff] }
  0x13   :  { %s31_s19 = sshll.u32 %s91_s18, 4  ;;  %23 = vst [vmem:[#allocation5] sm:$0xff] %v21_v0  ;;  %24 = vst [vmem:[#allocation5 + $0x8] sm:$0xff] %v22_v1  ;;  %s32_s19 = int_to_ptr.vmem [resolvable:$true] %s31_s19 }
  0x14   :  { %s64_s20 = scalar_lea.vmem %s32_s19, 256  ;;  %p69_p9 = scmp.lt.s32.totalorder %s32_s19, %s32_s19 }
  0x15   :  { %p65_p8 = scmp.ne.s32.totalorder %s32_s19, %s64_s20  ;;  %p70_p10 = scmp.lt.s32.totalorder %s64_s20, %s64_s20 }
  0x17   :  { %p71_p11 = por %p70_p10, %p69_p9 }
  0x19   :  { %p72_p12 = pnand %p71_p11, %p65_p8 }
  0x1b   :  { %75 = shalt.err (!%p72_p12)
}
  0x1c   :  { %s76_s0 = scalar_lea.hbm %s127_s1, 256 }
  0x1d   :  { %p77_p13 = scmp.ne.s32.totalorder %s127_s1, %s76_s0  ;;  %p80_p0 = scmp.lt.u32.totalorder %s76_s0, %s127_s1 }
  0x1f   :  { %p82_p1 = pnand %p80_p0, %p77_p13 }
  0x21   :  { %85 = shalt.err (!%p82_p1)
}
  0x22   :  { %34 = dma.vmem_to_hbm [thread:$0]  %s32_s19, 256, %s127_s1, [#allocation4]  }
  0x23   :  { %88 = dma.done.wait [#allocation4], 256  }
  0x24   :  { %89 = vsyncadd [#allocation4], 4294967040 }
  0x25   :  { %38 = vsyncpa [#allocation3], 1 }
  0x26   :  { %39 = vsyncpa [#allocation4], 1 }

</bundles_post_ra>
